<compile_context>
chip_gen: v5e
topology: v5e:2x2
jax: 0.10.0
libtpu: 0.0.40
codegen_flags: <defaults>
</compile_context>

<pallas_src>
import jax
import jax.numpy as jnp
from jax import lax
from jax.experimental import pallas as pl
from jax.experimental.pallas import tpu as pltpu

IGNORE_INDEX = -100
PAD_VALUE = 0


def _round_up(a, b):
    return (a + b - 1) // b * b


def _default_row_tile():
    """FLOPs per byte of streamed head weight == TR; pick TR near each chip's
    bf16-roofline crossover (peak_bf16 / HBM_BW)."""
    try:
        kind = jax.devices()[0].device_kind.lower()
    except Exception:
        return 256
    if "v6" in kind or "trillium" in kind:
        return 512        # 128 MiB VMEM, highest compute/BW ratio -> biggest TR
    if "v7" in kind or "7x" in kind:
        return 384        # 64 MiB VMEM: keep the double-buffered footprint modest
    return 256            # v5e and fallback


def prepare_net_params(embed, w_out, tv=256):
    """One-time (init) cast + pad of the synthetic net parameters.

    Doing this per forward was a full un-pipelined HBM read+write of the largest
    tensor (d_pad x v_pad); hoisting it here removes that traffic entirely.
    """
    vocab, d = embed.shape
    assert w_out.shape == (d, w_out.shape[1])
    v = w_out.shape[1]
    assert tv % 128 == 0, "vocab tile must be a multiple of 128 (lane width)"
    tv = min(tv, _round_up(v, 128))
    d_pad = _round_up(d, 128)
    v_pad = _round_up(v, tv)
    embed_p = jnp.pad(embed.astype(jnp.bfloat16), ((0, 0), (0, d_pad - d)))
    w_p = jnp.pad(w_out.astype(jnp.bfloat16), ((0, d_pad - d), (0, v_pad - v)))
    return dict(embed=embed_p, w=w_p, vocab=v, dim=d, d_pad=d_pad,
                v_pad=v_pad, tv=tv)


def _make_ce_kernel(vocab_size, tv, v_pad, ignore_index, with_logits):
    """Flash-CE kernel: online log-sum-exp over vocab tiles for one row tile."""
    pad_cols = v_pad != vocab_size   # static: column masking only needed then

    def kernel(tgt_ref, x_ref, w_ref, *refs):
        if with_logits:
            loss_ref, logits_ref = refs[0], refs[1]
            m_sc, l_sc, t_sc = refs[2], refs[3], refs[4]
        else:
            loss_ref = refs[0]
            m_sc, l_sc, t_sc = refs[1], refs[2], refs[3]

        j = pl.program_id(1)           # vocab tile index (reduction axis)

        @pl.when(j == 0)
        def _init():
            m_sc[...] = jnp.full_like(m_sc, -jnp.inf)
            l_sc[...] = jnp.zeros_like(l_sc)
            t_sc[...] = jnp.zeros_like(t_sc)

        # MXU: bf16 x bf16 -> f32 accumulate.
        logits = jnp.dot(x_ref[...], w_ref[...],
                         preferred_element_type=jnp.float32)          # (TR, TV)

        if with_logits:
            # bf16 writeback halves the dominant HBM traffic of the logits path
            logits_ref[...] = logits.astype(logits_ref.dtype)

        # Local lane iota (1, TV): no per-step (TR, TV) iota nor a (TR, TV) +j*tv add.
        col = lax.broadcasted_iota(jnp.int32, (1, tv), 1)

        if pad_cols:
            # Only the ragged last vocab tile has padded columns; the compare is a
            # cheap (1, TV)-vs-scalar op, padded lanes get -1e30 (exp underflows to 0).
            limit = vocab_size - j * tv
            logits = jnp.where(col < limit, logits, -1e30)

        tgt = tgt_ref[...]                                             # (TR, 1) i32
        tgt_local = tgt - j * tv                                       # (TR, 1)

        # Online log-sum-exp over the vocab axis (f32 VPU/EUP math, v5e-safe).
        m_prev = m_sc[...]
        m_new = jnp.maximum(m_prev, jnp.max(logits, axis=-1, keepdims=True))
        alpha = jnp.exp(m_prev - m_new)
        l_sc[...] = alpha * l_sc[...] + jnp.sum(jnp.exp(logits - m_new),
                                                axis=-1, keepdims=True)
        m_sc[...] = m_new

        # Running target-logit gather (ignore_index = -100 never lands in [0, tv)).
        t_sc[...] += jnp.sum(jnp.where(col == tgt_local, logits, 0.0),
                             axis=-1, keepdims=True)

        @pl.when(j == pl.num_programs(1) - 1)
        def _finalize():
            lse = m_sc[...] + jnp.log(l_sc[...])
            valid = (tgt != ignore_index).astype(jnp.float32)
            tile_loss = jnp.sum((lse - t_sc[...]) * valid)   # scalar, this row tile
            loss_ref[...] = jnp.broadcast_to(tile_loss, loss_ref.shape)

    return kernel


def _ce_pallas(tgt, x_emb, w, vocab_size, ignore_index, tr, tv, return_logits,
               w_buffers=2):
    r_pad, d_pad = x_emb.shape
    v_pad = w.shape[1]
    r_tiles = r_pad // tr
    v_tiles = v_pad // tv

    kernel = _make_ce_kernel(vocab_size, tv, v_pad, ignore_index, return_logits)

    out_shape = [jax.ShapeDtypeStruct((r_tiles, 8, 128), jnp.float32)]
    out_specs = [pl.BlockSpec((1, 8, 128), lambda i, j: (i, 0, 0))]
    if return_logits:
        out_shape.append(jax.ShapeDtypeStruct((r_pad, v_pad), jnp.bfloat16))
        out_specs.append(pl.BlockSpec((tr, tv), lambda i, j: (i, j)))

    w_spec_kwargs = {}
    if w_buffers != 2:
        # Deepen W buffering only when a sweep shows the W DMA still exposed.
        w_spec_kwargs["pipeline_mode"] = pl.Buffered(w_buffers)

    # Explicit VMEM budget so the pipeline stays double-buffered at large TR
    # (especially on v7x's 64 MiB physical VMEM).
    vmem_bytes = (2 * tr * d_pad * 2                    # x blocks (bf16, 2 bufs)
                  + max(w_buffers, 2) * d_pad * tv * 2  # W blocks (bf16)
                  + 2 * tr * 128 * 4                    # target blocks (lane-padded)
                  + 3 * tr * 128 * 4                    # LSE scratch (lane-padded)
                  + 2 * 8 * 128 * 4                     # loss output blocks
                  + tr * tv * 4)                        # f32 logits staging
    if return_logits:
        vmem_bytes += 2 * tr * tv * 2                   # bf16 logits out blocks
    vmem_limit = int(min(max(2 * vmem_bytes, 32 << 20), 64 << 20))

    flops = 2 * r_pad * d_pad * v_pad
    bytes_accessed = (r_pad * d_pad * 2 + r_tiles * v_pad * d_pad * 2
                      + r_pad * 4 + r_tiles * 8 * 128 * 4
                      + (r_pad * v_pad * 2 if return_logits else 0))

    return pl.pallas_call(
        kernel,
        out_shape=tuple(out_shape),
        grid=(r_tiles, v_tiles),
        in_specs=[
            # targets: one narrow block per row tile (re-DMA'd only when i changes)
            pl.BlockSpec((tr, 1), lambda i, j: (i, 0)),
            # activations: resident across all vocab steps of a row tile
            pl.BlockSpec((tr, d_pad), lambda i, j: (i, 0)),
            # head weight: one vocab slice per inner step
            pl.BlockSpec((d_pad, tv), lambda i, j: (0, j), **w_spec_kwargs),
        ],
        out_specs=tuple(out_specs),
        scratch_shapes=[
            pltpu.VMEM((tr, 1), jnp.float32),   # running max
            pltpu.VMEM((tr, 1), jnp.float32),   # running sum of exp
            pltpu.VMEM((tr, 1), jnp.float32),   # running target logit
        ],
        compiler_params=pltpu.CompilerParams(
            dimension_semantics=("parallel", "arbitrary"),
            vmem_limit_bytes=vmem_limit),
        cost_estimate=pl.CostEstimate(
            flops=flops, transcendentals=r_pad * v_pad,
            bytes_accessed=bytes_accessed),
    )(tgt, x_emb, w)


def autoregressive_wrapper_forward(x, params,
                                   ignore_index=IGNORE_INDEX,
                                   pad_value=PAD_VALUE,
                                   return_outputs=False,
                                   tr=None, w_buffers=2):
    """Equivalent of AutoregressiveWrapper.forward with a synthetic `net`
    (token embedding + linear head). `params` is the output of prepare_net_params
    (bf16 cast + padding hoisted to init)."""
    b, s = x.shape
    n = s - 1
    vocab, d_pad, tv = params["vocab"], params["d_pad"], params["tv"]

    inp, target = x[:, :-1], x[:, 1:]
    inp = jnp.where(inp == ignore_index, pad_value, inp)

    R = b * n
    if tr is None:
        tr = _default_row_tile()
    # Clamp TR to the problem; for large R keep TR at the roofline target so the
    # (parallel) row axis still yields >=2 tiles for v7x megacore.
    tr = min(tr, _round_up(R, 8))
    r_pad = _round_up(R, tr)

    # Pad the *token id* / target streams (tiny i32 copies) so the embedding gather
    # directly emits the padded flat activations — no (R, d) pad copy afterwards.
    ids = jnp.pad(inp.reshape(R), (0, r_pad - R), constant_values=pad_value)
    tgt = target.reshape(R).astype(jnp.int32)
    tgt_p = jnp.pad(tgt, (0, r_pad - R), constant_values=ignore_index)[:, None]

    # "net" front-end: embedding gather on the pre-padded bf16 table.
    # TODO(synk): fold this gather into the kernel to remove the HBM round trip.
    x_flat = jnp.take(params["embed"], ids, axis=0)          # (r_pad, d_pad) bf16

    outs = _ce_pallas(tgt_p, x_flat, params["w"], vocab, ignore_index,
                      tr, tv, return_outputs, w_buffers=w_buffers)

    # F.cross_entropy(reduction='mean', ignore_index=...) == sum(nll) / num_valid.
    # NOTE: an all-ignored batch returns 0 here; F.cross_entropy would yield NaN.
    loss_tiles = outs[0]                                     # (r_tiles, 8, 128)
    num_valid = jnp.sum((tgt != ignore_index).astype(jnp.float32))
    loss = jnp.sum(loss_tiles[:, 0, 0]) / jnp.maximum(num_valid, 1.0)

    if return_outputs:
        logits = outs[1][:R, :vocab].reshape(b, n, vocab)    # bf16
        return loss, logits
    return loss


def _ref_forward(x, embed, w_out, ignore_index=IGNORE_INDEX, pad_value=PAD_VALUE):
    """Pure-JAX f32 reference for correctness check."""
    inp, target = x[:, :-1], x[:, 1:]
    inp = jnp.where(inp == ignore_index, pad_value, inp)
    logits = jnp.take(embed, inp, axis=0).astype(jnp.float32) @ w_out.astype(jnp.float32)
    logp = jax.nn.log_softmax(logits, axis=-1)
    valid = target != ignore_index
    tgt_safe = jnp.where(valid, target, 0)
    nll = -jnp.take_along_axis(logp, tgt_safe[..., None], axis=-1)[..., 0]
    loss = jnp.sum(nll * valid) / jnp.maximum(jnp.sum(valid), 1)
    return loss, logits


if __name__ == "__main__":
    key = jax.random.PRNGKey(0)
    k_tok, k_emb, k_w, k_tok2, k_emb2, k_w2 = jax.random.split(key, 6)

    batch, seq, dim = 2, 8, 32

    # ---- config 1: vocab NOT a tile multiple -> ragged last vocab tile path ----
    vocab = 300
    embed = jax.random.normal(k_emb, (vocab, dim), dtype=jnp.float32) * 0.02
    w_out = jax.random.normal(k_w, (dim, vocab), dtype=jnp.float32) * 0.02
    params = prepare_net_params(embed, w_out, tv=128)   # 3 vocab tiles, last ragged

    x = jax.random.randint(k_tok, (batch, seq), 0, vocab, dtype=jnp.int32)
    x = x.at[1, 5].set(IGNORE_INDEX)                    # ignore_index in inp & target

    loss = jax.block_until_ready(autoregressive_wrapper_forward(x, params))
    loss2, logits = autoregressive_wrapper_forward(x, params, return_outputs=True)
    loss2, logits = jax.block_until_ready((loss2, logits))

    ref_loss, ref_logits = _ref_forward(x, embed, w_out)
    ref_loss, ref_logits = jax.block_until_ready((ref_loss, ref_logits))

    # tolerances account for bf16 MXU inputs (and bf16 logits output) vs f32 ref
    assert jnp.allclose(loss, ref_loss, rtol=1e-3, atol=1e-3), (loss, ref_loss)
    assert jnp.allclose(loss2, ref_loss, rtol=1e-3, atol=1e-3), (loss2, ref_loss)
    assert jnp.allclose(logits.astype(jnp.float32), ref_logits,
                        rtol=2e-2, atol=1e-3), "logits mismatch"

    # ---- config 2: vocab IS a tile multiple -> padding-free static path ----
    vocab2 = 256
    embed2 = jax.random.normal(k_emb2, (vocab2, dim), dtype=jnp.float32) * 0.02
    w_out2 = jax.random.normal(k_w2, (dim, vocab2), dtype=jnp.float32) * 0.02
    params2 = prepare_net_params(embed2, w_out2, tv=256)
    x2 = jax.random.randint(k_tok2, (batch, seq), 0, vocab2, dtype=jnp.int32)

    loss3 = jax.block_until_ready(autoregressive_wrapper_forward(x2, params2))
    ref_loss2, _ = _ref_forward(x2, embed2, w_out2)
    ref_loss2 = jax.block_until_ready(ref_loss2)
    assert jnp.allclose(loss3, ref_loss2, rtol=1e-3, atol=1e-3), (loss3, ref_loss2)

    print("KERNEL_OK")
</pallas_src>

<mosaic_0001>
module attributes {stable_mosaic.version = 11 : i64} {
  func.func @kernel(%arg0: i32, %arg1: i32, %arg2: memref<16x1xi32, #tpu.memory_space<vmem>>, %arg3: memref<16x128xbf16, #tpu.memory_space<vmem>>, %arg4: memref<128x128xbf16, #tpu.memory_space<vmem>>, %arg5: memref<1x8x128xf32, #tpu.memory_space<vmem>>, %arg6: memref<16x1xf32, #tpu.memory_space<vmem>>, %arg7: memref<16x1xf32, #tpu.memory_space<vmem>>, %arg8: memref<16x1xf32, #tpu.memory_space<vmem>>) attributes {dimension_semantics = [#tpu.dimension_semantics<parallel>, #tpu.dimension_semantics<arbitrary>], iteration_bounds = array<i64: 1, 3>, scalar_prefetch = 0 : i64, scratch_operands = 3 : i64, tpu.core_type = #tpu.core_type<tc>, window_params = [{transform_indices = @transform_0, window_bounds = array<i64: 16, 1>}, {transform_indices = @transform_1, window_bounds = array<i64: 16, 128>}, {transform_indices = @transform_2, window_bounds = array<i64: 128, 128>}, {transform_indices = @transform_3, window_bounds = array<i64: 1, 8, 128>}]} {
    %c0_i32 = arith.constant 0 : i32
    %0 = arith.cmpi eq, %arg1, %c0_i32 : i32
    %1 = arith.extui %0 : i1 to i32
    %c0_i32_0 = arith.constant 0 : i32
    %2 = arith.cmpi ne, %1, %c0_i32_0 : i32
    scf.if %2 {
      %cst_25 = arith.constant 0xFF800000 : f32
      %48 = vector.broadcast %cst_25 : f32 to vector<16x1xf32>
      %c0_26 = arith.constant 0 : index
      %c0_27 = arith.constant 0 : index
      %49 = vector.load %arg6[%c0_26, %c0_27] : memref<16x1xf32, #tpu.memory_space<vmem>>, vector<16x1xf32>
      tpu.vector_store %arg6[%c0_26, %c0_27], %48 {strides = array<i32>} : memref<16x1xf32, #tpu.memory_space<vmem>>, vector<16x1xf32>,
      %cst_28 = arith.constant 0.000000e+00 : f32
      %50 = vector.broadcast %cst_28 : f32 to vector<16x1xf32>
      %c0_29 = arith.constant 0 : index
      %c0_30 = arith.constant 0 : index
      %51 = vector.load %arg7[%c0_29, %c0_30] : memref<16x1xf32, #tpu.memory_space<vmem>>, vector<16x1xf32>
      tpu.vector_store %arg7[%c0_29, %c0_30], %50 {strides = array<i32>} : memref<16x1xf32, #tpu.memory_space<vmem>>, vector<16x1xf32>,
      %cst_31 = arith.constant 0.000000e+00 : f32
      %52 = vector.broadcast %cst_31 : f32 to vector<16x1xf32>
      %c0_32 = arith.constant 0 : index
      %c0_33 = arith.constant 0 : index
      %53 = vector.load %arg8[%c0_32, %c0_33] : memref<16x1xf32, #tpu.memory_space<vmem>>, vector<16x1xf32>
      tpu.vector_store %arg8[%c0_32, %c0_33], %52 {strides = array<i32>} : memref<16x1xf32, #tpu.memory_space<vmem>>, vector<16x1xf32>,
    } else {
    }
    %c0 = arith.constant 0 : index
    %c0_1 = arith.constant 0 : index
    %3 = vector.load %arg3[%c0, %c0_1] : memref<16x128xbf16, #tpu.memory_space<vmem>>, vector<16x128xbf16>
    %c0_2 = arith.constant 0 : index
    %c0_3 = arith.constant 0 : index
    %4 = vector.load %arg4[%c0_2, %c0_3] : memref<128x128xbf16, #tpu.memory_space<vmem>>, vector<128x128xbf16>
    %cst = arith.constant dense<0.000000e+00> : vector<16x128xf32>
    %5 = tpu.matmul %3, %4, %cst {dimension_numbers = #tpu.dot_dimension_numbers<[1], [0], [0], [1], [0, 0, 1, 1], [], []>} : vector<16x128xbf16>, vector<128x128xbf16>, vector<16x128xf32> -> vector<16x128xf32>
    %6 = tpu.iota {dimensions = array<i32: 1>} : vector<1x128xi32>
    %c128_i32 = arith.constant 128 : i32
    %7 = arith.muli %arg1, %c128_i32 : i32
    %c300_i32 = arith.constant 300 : i32
    %8 = arith.subi %c300_i32, %7 : i32
    %9 = vector.broadcast %8 : i32 to vector<1x128xi32>
    %10 = arith.cmpi slt, %6, %9 : vector<1x128xi32>
    %cst_4 = arith.constant -1.000000e+30 : f32
    %11 = vector.shape_cast %10 : vector<1x128xi1> to vector<1x128xi1>
    %12 = vector.broadcast %11 : vector<1x128xi1> to vector<16x128xi1>
    %13 = vector.broadcast %cst_4 : f32 to vector<16x128xf32>
    %14 = arith.select %12, %5, %13 : vector<16x128xi1>, vector<16x128xf32>
    %c0_5 = arith.constant 0 : index
    %c0_6 = arith.constant 0 : index
    %15 = vector.load %arg2[%c0_5, %c0_6] : memref<16x1xi32, #tpu.memory_space<vmem>>, vector<16x1xi32>
    %c128_i32_7 = arith.constant 128 : i32
    %16 = arith.muli %arg1, %c128_i32_7 : i32
    %17 = vector.broadcast %16 : i32 to vector<16x1xi32>
    %18 = arith.subi %15, %17 : vector<16x1xi32>
    %c0_8 = arith.constant 0 : index
    %c0_9 = arith.constant 0 : index
    %19 = vector.load %arg6[%c0_8, %c0_9] : memref<16x1xf32, #tpu.memory_space<vmem>>, vector<16x1xf32>
    %cst_10 = arith.constant dense<0xFF800000> : vector<16xf32>
    %20 = vector.multi_reduction <maximumf>, %14, %cst_10 [1] : vector<16x128xf32> to vector<16xf32>
    %21 = vector.shape_cast %20 : vector<16xf32> to vector<16x1xf32>
    %22 = arith.maximumf %19, %21 : vector<16x1xf32>
    %23 = arith.subf %19, %22 : vector<16x1xf32>
    %24 = math.exp %23 : vector<16x1xf32>
    %c0_11 = arith.constant 0 : index
    %c0_12 = arith.constant 0 : index
    %25 = vector.load %arg7[%c0_11, %c0_12] : memref<16x1xf32, #tpu.memory_space<vmem>>, vector<16x1xf32>
    %26 = arith.mulf %24, %25 : vector<16x1xf32>
    %27 = vector.broadcast %22 : vector<16x1xf32> to vector<16x128xf32>
    %28 = arith.subf %14, %27 : vector<16x128xf32>
    %29 = math.exp %28 : vector<16x128xf32>
    %cst_13 = arith.constant dense<0.000000e+00> : vector<16xf32>
    %30 = vector.multi_reduction <add>, %29, %cst_13 [1] : vector<16x128xf32> to vector<16xf32>
    %31 = vector.shape_cast %30 : vector<16xf32> to vector<16x1xf32>
    %32 = arith.addf %26, %31 : vector<16x1xf32>
    %c0_14 = arith.constant 0 : index
    %c0_15 = arith.constant 0 : index
    %33 = vector.load %arg7[%c0_14, %c0_15] : memref<16x1xf32, #tpu.memory_space<vmem>>, vector<16x1xf32>
    tpu.vector_store %arg7[%c0_14, %c0_15], %32 {strides = array<i32>} : memref<16x1xf32, #tpu.memory_space<vmem>>, vector<16x1xf32>,
    %c0_16 = arith.constant 0 : index
    %c0_17 = arith.constant 0 : index
    %34 = vector.load %arg6[%c0_16, %c0_17] : memref<16x1xf32, #tpu.memory_space<vmem>>, vector<16x1xf32>
    tpu.vector_store %arg6[%c0_16, %c0_17], %22 {strides = array<i32>} : memref<16x1xf32, #tpu.memory_space<vmem>>, vector<16x1xf32>,
    %c0_18 = arith.constant 0 : index
    %c0_19 = arith.constant 0 : index
    %35 = vector.load %arg8[%c0_18, %c0_19] : memref<16x1xf32, #tpu.memory_space<vmem>>, vector<16x1xf32>
    %36 = vector.broadcast %6 : vector<1x128xi32> to vector<16x128xi32>
    %37 = vector.broadcast %18 : vector<16x1xi32> to vector<16x128xi32>
    %38 = arith.cmpi eq, %36, %37 : vector<16x128xi32>
    %cst_20 = arith.constant 0.000000e+00 : f32
    %39 = vector.broadcast %cst_20 : f32 to vector<16x128xf32>
    %40 = arith.select %38, %14, %39 : vector<16x128xi1>, vector<16x128xf32>
    %cst_21 = arith.constant dense<0.000000e+00> : vector<16xf32>
    %41 = vector.multi_reduction <add>, %40, %cst_21 [1] : vector<16x128xf32> to vector<16xf32>
    %42 = vector.shape_cast %41 : vector<16xf32> to vector<16x1xf32>
    %43 = arith.addf %35, %42 : vector<16x1xf32>
    %c0_22 = arith.constant 0 : index
    %c0_23 = arith.constant 0 : index
    %44 = vector.load %arg8[%c0_22, %c0_23] : memref<16x1xf32, #tpu.memory_space<vmem>>, vector<16x1xf32>
    tpu.vector_store %arg8[%c0_22, %c0_23], %43 {strides = array<i32>} : memref<16x1xf32, #tpu.memory_space<vmem>>, vector<16x1xf32>,
    %c2_i32 = arith.constant 2 : i32
    %45 = arith.cmpi eq, %arg1, %c2_i32 : i32
    %46 = arith.extui %45 : i1 to i32
    %c0_i32_24 = arith.constant 0 : i32
    %47 = arith.cmpi ne, %46, %c0_i32_24 : i32
    scf.if %47 {
      %c0_25 = arith.constant 0 : index
      %c0_26 = arith.constant 0 : index
      %48 = vector.load %arg6[%c0_25, %c0_26] : memref<16x1xf32, #tpu.memory_space<vmem>>, vector<16x1xf32>
      %c0_27 = arith.constant 0 : index
      %c0_28 = arith.constant 0 : index
      %49 = vector.load %arg7[%c0_27, %c0_28] : memref<16x1xf32, #tpu.memory_space<vmem>>, vector<16x1xf32>
      %50 = math.log %49 : vector<16x1xf32>
      %51 = arith.addf %48, %50 : vector<16x1xf32>
      %c-100_i32 = arith.constant -100 : i32
      %52 = vector.broadcast %c-100_i32 : i32 to vector<16x1xi32>
      %53 = arith.cmpi ne, %15, %52 : vector<16x1xi32>
      %54 = arith.extui %53 : vector<16x1xi1> to vector<16x1xi32>
      %55 = arith.sitofp %54 : vector<16x1xi32> to vector<16x1xf32>
      %c0_29 = arith.constant 0 : index
      %c0_30 = arith.constant 0 : index
      %56 = vector.load %arg8[%c0_29, %c0_30] : memref<16x1xf32, #tpu.memory_space<vmem>>, vector<16x1xf32>
      %57 = arith.subf %51, %56 : vector<16x1xf32>
      %58 = arith.mulf %57, %55 : vector<16x1xf32>
      %59 = vector.shape_cast %58 : vector<16x1xf32> to vector<1x16x1xf32>
      %cst_31 = arith.constant dense<0.000000e+00> : vector<1xf32>
      %60 = vector.multi_reduction <add>, %59, %cst_31 [1, 2] : vector<1x16x1xf32> to vector<1xf32>
      %61 = vector.shape_cast %60 : vector<1xf32> to vector<1x1x1xf32>
      %62 = vector.extract %61[0, 0, 0] : f32 from vector<1x1x1xf32>
      %63 = vector.broadcast %62 : f32 to vector<1x8x128xf32>
      %c0_32 = arith.constant 0 : index
      %c0_33 = arith.constant 0 : index
      %c0_34 = arith.constant 0 : index
      %64 = vector.load %arg5[%c0_32, %c0_33, %c0_34] : memref<1x8x128xf32, #tpu.memory_space<vmem>>, vector<1x8x128xf32>
      tpu.vector_store %arg5[%c0_32, %c0_33, %c0_34], %63 {strides = array<i32>} : memref<1x8x128xf32, #tpu.memory_space<vmem>>, vector<1x8x128xf32>,
    } else {
    }
    return
  }
  func.func @transform_0(%arg0: i32, %arg1: i32) -> (i32, i32) {
    %c0_i32 = arith.constant 0 : i32
    %c0_i32_0 = arith.constant 0 : i32
    return %arg0, %c0_i32 : i32, i32
  }
  func.func @transform_1(%arg0: i32, %arg1: i32) -> (i32, i32) {
    %c0_i32 = arith.constant 0 : i32
    %c0_i32_0 = arith.constant 0 : i32
    return %arg0, %c0_i32 : i32, i32
  }
  func.func @transform_2(%arg0: i32, %arg1: i32) -> (i32, i32) {
    %c0_i32 = arith.constant 0 : i32
    %c0_i32_0 = arith.constant 0 : i32
    return %c0_i32, %arg1 : i32, i32
  }
  func.func @transform_3(%arg0: i32, %arg1: i32) -> (i32, i32, i32) {
    %c0_i32 = arith.constant 0 : i32
    %c0_i32_0 = arith.constant 0 : i32
    %c0_i32_1 = arith.constant 0 : i32
    return %arg0, %c0_i32, %c0_i32_0 : i32, i32, i32
  }
}

</mosaic_0001>

<bundles_post_ra>
// kernel: tpu_custom_call.1
= control target key start
LH: loop header
LB: loop body
LE: loop exit
PB: predicated region body
PF: predicated region fallthrough
CT: control target
= control target key end

     0   :  { %8 = vsyncpa [#allocation6], 0  ;;  %s977_s0 = inlined_call_operand.vmem [shape: s32[16,1], index: 0, kind: input, shape index: {}]   ;;  %s978_s1 = inlined_call_operand.vmem [shape: bf16[16,128], index: 1, kind: input, shape index: {}]   ;;  %s979_s2 = inlined_call_operand.hbm [shape: bf16[128,384], index: 2, kind: input, shape index: {}]   ;;  %s980_s3 = inlined_call_operand.hbm [shape: f32[1,8,128], index: 3, kind: output, shape index: {}]  }
   0x1   :  { %10 = vsyncpa [#allocation6 + $0x1], 0 }
   0x2   :  { %11 = vsyncpa [#allocation7], 0  ;;  %s849_s12 = smov 0   ;;  %s851_s13 = smov 0  }
   0x3   :  { %s853_s14 = smov 0   ;;  %s855_s15 = smov 0  }
   0x4   :  { %s857_s16 = smov 0   ;;  %s859_s17 = smov 0  }
   0x5 LB: > { %s558_s18 = sadd.s32 4294967295, %s819_s17   ;;  %s26_s19 = sadd.s32 1, %s815_s16  ;;  %s819_s17 = sphi %s859_s17, %s17_s17   ;;  %s815_s16 = sphi %s857_s16, %s987_s16   ;;  %s811_s15 = sphi %s855_s15, %s986_s15   ;;  %s807_s14 = sphi %s853_s14, %s985_s14   ;;  %s803_s13 = sphi %s851_s13, %s984_s13   ;;  %s799_s12 = sphi %s849_s12, %s983_s12  }
   0x6   : > { %p27_p0 = scmp.ge.s32.totalorder %s26_s19, 3  ;;  %s88_s20 = sadd.s32 1, %s807_s14 }
   0x7   : > { %p95_p1 = scmp.ne.s32.totalorder %s807_s14, %s803_s13  ;;  %p96_p2 = scmp.eq.s32.totalorder %s819_s17, 0 }
   0x8   : > { %s989_s19 = smov (%p27_p0, %s26_s19), 0  ;;  %p101_p4 = scmp.ne.s32.totalorder %s803_s13, %s799_s12 }
   0x9   : > { %p885_p3 = por %p96_p2, %p95_p1  ;;  %s85_s22 = ssub.s32 %s815_s16, %s989_s19 }
   0xa   : > { %p102_p5 = scmp.eq.s32.totalorder %s558_s18, 0  ;;  %p86_p6 = scmp.eq.s32.totalorder %s85_s22, 0 }
   0xb   : > { %p633_p8 = scmp.lt.s32.totalorder %s819_s17, 3  ;;  %s169_s25 = sand.u32 1, %s807_s14  }
   0xc   : > { %p894_p7 = por %p102_p5, %p101_p4  ;;  %s564_s26 = sshll.u32 %s815_s16, 2 }
   0xd   : > { %s900_s24 = scalar_select %p86_p6, %s807_s14, %s88_s20  }
   0xe   : > { %s563_s27 = sshll.u32 %s169_s25, 6  ;;  %s177_s30 = scalar_lea.hbm %s979_s2, %s564_s26 }
   0xf   : > { %s178_s4 = sshll.u32 %s177_s30, 4  ;;  %s173_s5 = scalar_lea.vmem [#allocation5], %s563_s27  ;;  %s179_s4 = int_to_ptr.hbm [resolvable:$true] %s178_s4 }
  0x10   : > { %s180_s6 = sshll.u32 %s173_s5, 4  ;;  %p630_p9 = pnand %p633_p8, %p885_p3  ;;  %s181_s6 = int_to_ptr.vmem [resolvable:$true] %s180_s6 }
  0x11   : > { %p565_p10 = scmp.ge.s32.totalorder %s819_s17, 1  ;;  %s170_s7 = scalar_lea.sflag [#allocation6], %s169_s25 }
  0x12   : > { %s821_s8 = smov 192   ;;  %s822_s9 = smov 64  }
  0x13   : > { %s823_s10 = smov 4   ;;  %p188_p11 = scmp.lt.s32.totalorder %s819_s17, 4 }
  0x14   : > { %632 = dma.hbm_to_vmem [thread:$0]  (!%p630_p9), %s179_s4, 1024, %s181_s6, %s170_s7, %s821_s8, %s822_s9, %s823_s10  }
  0x15   : > { %p189_p12 = pnand %p565_p10, %p188_p11 }
  0x16   : > { %s194_s11 = sand.u32 (!%p189_p12), 1, %s803_s13  }
  0x17   : > { %192 = sbr.rel (%p189_p12) target bundleno = 784 (0x310), region = 32  ;;  %s566_s12 = sshll.u32 (!%p189_p12), %s194_s11, 6 }
  0x18   : > { %s195_s20 = scalar_lea.sflag (!%p189_p12), [#allocation6], %s194_s11  ;;  %s912_s22 = scalar_lea.vmem (!%p189_p12), [#allocation5], %s566_s12 }
  0x1c   : > { %790 = dma.done.wait (%p894_p7), %s195_s20, 1024  }
  0x1d   : > { %792 = vsyncadd (%p894_p7), %s195_s20, 4294966272  ;;  %p567_p13 = scmp.ne.s32.totalorder %s811_s15, 0 }
  0x1f   : > { %242 = sbr.rel (%p567_p13) target bundleno = 43 (0x2b), region = 40 }
  0x24   : > { %vm243_vm0 = vcmask 7168   ;;  %v824_v0 = vmov -inf   ;;  %v825_v1 = vmov 0.0  }
  0x25   : > { %244 = vst.msk [vmem:[#allocation2] sm:$0xff] %vm243_vm0, %v824_v0 }
  0x26   : > { %245 = vst.msk [vmem:[#allocation2 + $0x8] sm:$0xff] %vm243_vm0, %v824_v0 }
  0x27   : > { %246 = vst.msk [vmem:[#allocation3] sm:$0xff] %vm243_vm0, %v825_v1 }
  0x28   : > { %247 = vst.msk [vmem:[#allocation3 + $0x8] sm:$0xff] %vm243_vm0, %v825_v1 }
  0x29   : > { %248 = vst.msk [vmem:[#allocation4] sm:$0xff] %vm243_vm0, %v825_v1 }
  0x2a   : > { %249 = vst.msk [vmem:[#allocation4 + $0x8] sm:$0xff] %vm243_vm0, %v825_v1 }
  0x2b PF: > { %v620_v2 = vld [vmem:[%s912_s22 + $0x38] sm:$0xff]  ;;  %s604_s21 = sshll.u32 %s811_s15, 7  ;;  %v619_v4 = vld [vmem:[%s912_s22 + $0x30] sm:$0xff]  ;;  %v826_v5 = vmov 0   ;;  %v618_v8 = vld [vmem:[%s912_s22 + $0x28] sm:$0xff]  ;;  %v336_v17 = vlaneseq  ;;  %vm391_vm3 = vcmask 7168  }
  0x2c   : > { %v348_v3 = vstv %s604_s21  ;;  %322 = vmatpush.bf16.msra.mxu0 %v620_v2  ;;  %693 = vset.pattern.permute.xlu2 %v826_v5  ;;  %v925_v6 = vld [vmem:[%s977_s0] sm:$0xff]  ;;  %v932_v9 = vld [vmem:[%s977_s0 + $0x8] sm:$0xff]  ;;  %v617_v10 = vld [vmem:[%s912_s22 + $0x20] sm:$0xff]  ;;  %s339_s30 = ssub.s32 300, %s604_s21  ;;  %p605_p0 = scmp.ne.s32.totalorder %s811_s15, 2 }
  0x2d   : > { %692 = vset.pattern.permute.xlu1 %v826_v5  ;;  %694 = vset.pattern.permute.xlu0 %v826_v5  ;;  %v349_v7 = vsub.s32 %v925_v6, %v348_v3  ;;  %v350_v11 = vsub.s32 %v932_v9, %v348_v3  ;;  %v616_v12 = vld [vmem:[%s912_s22 + $0x18] sm:$0xff]  ;;  %v615_v13 = vld [vmem:[%s912_s22 + $0x10] sm:$0xff]  ;;  %v614_v14 = vld [vmem:[%s912_s22 + $0x8] sm:$0xff]  ;;  %v337_v18 = vand.u32 127, %v336_v17  ;;  %v340_v19 = vstv %s339_s30 }
  0x2e   : > { %v613_v15 = vld [vmem:[%s912_s22] sm:$0xff]  ;;  %v612_v16 = vld [vmem:[%s978_s1] sm:$0xff]  ;;  %v352_v34 = vld [vmem:[#allocation2 + $0x8] sm:$0xff] }
  0x2f   : > { %399 = vperm.xlu2 %693, %v349_v7   ;;  %vm341_vm1 = vcmp.lt.s32.totalorder %v337_v18, %v340_v19  ;;  %v351_v27 = vld [vmem:[#allocation2] sm:$0xff]  ;;  %v365_v50 = vld [vmem:[#allocation3] sm:$0xff]  ;;  %v366_v55 = vld [vmem:[#allocation3 + $0x8] sm:$0xff] }
  0x30   : > { %323 = vmatpush.bf16.msra.mxu0 %v619_v4  ;;  %v396_v28 = vld [vmem:[#allocation4] sm:$0xff] }
  0x31   : > { %v397_v56 = vld [vmem:[#allocation4 + $0x8] sm:$0xff] }
  0x34   : > { %324 = vmatpush.bf16.msra.mxu0 %v618_v8 }
  0x37   : > { %402 = vperm.xlu2 %693, %v350_v11  }
  0x38   : > { %325 = vmatpush.bf16.msra.mxu0 %v617_v10 }
  0x3c   : > { %326 = vmatpush.bf16.msra.mxu0 %v616_v12 }
  0x40   : > { %327 = vmatpush.bf16.msra.mxu0 %v615_v13 }
  0x44   : > { %328 = vmatpush.bf16.msra.mxu0 %v614_v14 }
  0x48   : > { %329 = vmatpush.bf16.msra.mxu0 %v613_v15 }
  0x4b   : > { %330 = vmatmul.bf16.vlgmr.msra.gmra.mxu0 %v612_v16 }
  0x89   : > { %v400_v20 = vpop.permute.xlu2 %399 }
  0x8a   : > { %vm404_vm2 = vcmp.eq.s32.totalorder %v337_v18, %v400_v20 }
  0x91   : > { %v403_v26 = vpop.permute.xlu2 %402 }
  0x92   : > { %vm405_vm4 = vcmp.eq.s32.totalorder %v337_v18, %v403_v26 }
  0xc8   : > { %v331_v21 = vpop.f32.mrf.mxu0 }
  0xc9   : > { %v344_v22 = vsel %vm341_vm1, %v331_v21, -1e+30 }
  0xca   : > { %353 = vmax.xlane.f32.xlu0 %v344_v22  ;;  %v406_v23 = vsel %vm404_vm2, %v344_v22, 0.0 }
  0xcb   : > { %408 = vadd.xlane.f32.xlu2 %v406_v23 }
  0xd0   : > { %v333_v24 = vpop.f32.mrf.mxu0 }
  0xd1   : > { %v345_v25 = vsel %vm341_vm1, %v333_v24, -1e+30 }
  0xd2   : > { %355 = vmax.xlane.f32.xlu0 %v345_v25  ;;  %v407_v46 = vsel %vm405_vm4, %v345_v25, 0.0 }
 0x13d   : > { %v354_v29 = vpop.xlane.xlu0 %353 }
 0x13e   : > { %v357_v30 = vmax.f32 %v351_v27, %v354_v29  ;;  %v409_v31 = vpop.xlane.xlu2 %408 }
 0x13f   : > { %v412_v32 = vadd.f32 %v409_v31, %v396_v28 }
 0x140   : > { %v359_v33 = vsub.f32 %v351_v27, %v357_v30  ;;  %394 = vst.msk [vmem:[#allocation2] sm:$0xff] %vm391_vm3, %v357_v30  ;;  %371 = vperm.xlu1 %692, %v357_v30  }
 0x141   : > { %414 = vst.msk [vmem:[#allocation4] sm:$0xff] %vm391_vm3, %v412_v32 }
 0x142   : > { %v361_v47 = vmul.f32 1.442695, %v359_v33 }
 0x145   : > { %v356_v35 = vpop.xlane.xlu0 %355 }
 0x146   : > { %v358_v36 = vmax.f32 %v352_v34, %v356_v35 }
 0x148   : > { %v360_v37 = vsub.f32 %v352_v34, %v358_v36  ;;  %395 = vst.msk [vmem:[#allocation2 + $0x8] sm:$0xff] %vm391_vm3, %v358_v36  ;;  %376 = vperm.xlu1 %692, %v358_v36  }
 0x14a   : > { %v363_v48 = vmul.f32 1.442695, %v360_v37 }
 0x1b2   : > { %v372_v38 = vpop.permute.xlu1 %371 }
 0x1b3   : > { %v379_v39 = vsub.f32 %v344_v22, %v372_v38 }
 0x1b5   : > { %v381_v40 = vmul.f32 1.442695, %v379_v39 }
 0x1b7   : > { %695 = vpow2.f32 %v381_v40 }
 0x1ba   : > { %v377_v41 = vpop.permute.xlu1 %376 }
 0x1bb   : > { %v380_v42 = vsub.f32 %v345_v25, %v377_v41 }
 0x1bd   : > { %v696_v43 = vpop.eup %695  ;;  %v383_v44 = vmul.f32 1.442695, %v380_v42 }
 0x1be   : > { %385 = vadd.xlane.f32.xlu0 %v696_v43 }
 0x1bf   : > { %697 = vpow2.f32 %v383_v44 }
 0x1c0   : > { %699 = vpow2.f32 %v361_v47 }
 0x1c1   : > { %701 = vpow2.f32 %v363_v48 }
 0x1c5   : > { %v698_v45 = vpop.eup %697 }
 0x1c6   : > { %387 = vadd.xlane.f32.xlu1 %v698_v45  ;;  %410 = vadd.xlane.f32.xlu0 %v407_v46  ;;  %v700_v49 = vpop.eup %699 }
 0x1c7   : > { %v367_v51 = vmul.f32 %v700_v49, %v365_v50  ;;  %v702_v54 = vpop.eup %701 }
 0x1c8   : > { %v368_v57 = vmul.f32 %v702_v54, %v366_v55 }
 0x231   : > { %v386_v52 = vpop.xlane.xlu0 %385 }
 0x232   : > { %v389_v53 = vadd.f32 %v386_v52, %v367_v51 }
 0x234   : > { %392 = vst.msk [vmem:[#allocation3] sm:$0xff] %vm391_vm3, %v389_v53 }
 0x239   : > { %v388_v58 = vpop.xlane.xlu1 %387  ;;  %v411_v59 = vpop.xlane.xlu0 %410  ;;  %419 = sbr.rel (%p605_p0) target bundleno = 778 (0x30a), region = 44 }
 0x23a   : > { %v390_v60 = vadd.f32 %v388_v58, %v368_v57  ;;  %v413_v61 = vadd.f32 %v411_v59, %v397_v56 }
 0x23c   : > { %393 = vst.msk [vmem:[#allocation3 + $0x8] sm:$0xff] %vm391_vm3, %v390_v60 }
 0x23d   : > { %415 = vst.msk [vmem:[#allocation4 + $0x8] sm:$0xff] %vm391_vm3, %v413_v61 }
 0x23e   : > { %v422_v62 = vld [vmem:[#allocation3] sm:$0xff]  ;;  %v420_v1 = vld [vmem:[#allocation2] sm:$0xff]  ;;  %v421_v3 = vld [vmem:[#allocation2 + $0x8] sm:$0xff]  ;;  %vm430_vm5 = vcmp.ne.s32.totalorder %v925_v6, 4294967196  ;;  %vm431_vm6 = vcmp.ne.s32.totalorder %v932_v9, 4294967196  ;;  %v827_v12 = vmov 0.0  }
 0x23f   : > { %703 = vlog2.f32 %v422_v62  ;;  %v436_v7 = vld [vmem:[#allocation4] sm:$0xff]  ;;  %v606_v13 = vsel %vm430_vm5, 1.0, %v827_v12  ;;  %v607_v14 = vsel %vm431_vm6, 1.0, %v827_v12 }
 0x243   : > { %v423_v63 = vld [vmem:[#allocation3 + $0x8] sm:$0xff] }
 0x244   : > { %705 = vlog2.f32 %v423_v63  ;;  %v437_v10 = vld [vmem:[#allocation4 + $0x8] sm:$0xff] }
 0x245   : > { %v704_v0 = vpop.eup %703 }
 0x246   : > { %v425_v4 = vmul.f32 0.6931472, %v704_v0 }
 0x248   : > { %v428_v8 = vadd.f32 %v425_v4, %v420_v1 }
 0x24a   : > { %v706_v2 = vpop.eup %705  ;;  %v438_v15 = vsub.f32 %v428_v8, %v436_v7 }
 0x24b   : > { %v427_v5 = vmul.f32 0.6931472, %v706_v2 }
 0x24c   : > { %v440_v17 = vmul.f32 %v606_v13, %v438_v15 }
 0x24d   : > { %v429_v11 = vadd.f32 %v427_v5, %v421_v3 }
 0x24e   : > { %v442_v19 = vsel %vm391_vm3, %v440_v17, 0.0 }
 0x24f   : > { %v439_v16 = vsub.f32 %v429_v11, %v437_v10 }
 0x251   : > { %v441_v18 = vmul.f32 %v607_v14, %v439_v16 }
 0x253   : > { %v443_v20 = vsel %vm391_vm3, %v441_v18, 0.0 }
 0x254   : > { %v444_v21 = vadd.f32 %v443_v20, %v442_v19 }
 0x256   : > { %445 = vadd.xlane.f32.xlu0 %v444_v21 }
 0x2c9   : > { %v446_v6 = vpop.xlane.xlu0 %445 }
 0x2ca   : > { %v447_v22 = vrot.slane %v446_v6, 4 }
 0x2cc   : > { %v448_v9 = vadd.f32 %v447_v22, %v446_v6 }
 0x2ce   : > { %v449_v23 = vrot.slane %v448_v9, 2 }
 0x2d0   : > { %v450_v24 = vadd.f32 %v449_v23, %v448_v9 }
 0x2d2   : > { %v451_v25 = vrot.slane %v450_v24, 1 }
 0x2d4   : > { %v452_v26 = vadd.f32 %v451_v25, %v450_v24 }
 0x2d6   : > { %621 = vpush %v452_v26 }
 0x307   : > { %s622_s15 = spop %621 }
 0x308   : > { %v454_v27 = vstv %s622_s15 }
 0x309   : > { %455 = vst [vmem:[#allocation8] sm:$0xff] %v454_v27 }
 0x30a PF: > { %p634_p1 = scmp.eq.s32.totalorder %s558_s18, 2  ;;  %s466_s6 = sshll.u32 %s980_s3, 4  ;;  %s467_s6 = int_to_ptr.hbm [resolvable:$true] %s466_s6 }
 0x30b   : > { %s828_s7 = smov [#allocation8]  }
 0x30c   : > { %s464_s8 = sshll.u32 %s828_s7, 4  ;;  %s465_s8 = int_to_ptr.vmem [resolvable:$true] %s464_s8 }
 0x30d   : > { %626 = dma.vmem_to_hbm [thread:$0]  (%p634_p1), %s465_s8, 128, %s467_s6, [#allocation7]  }
 0x30e   : > { %794 = dma.done.wait (%p634_p1), [#allocation7], 128  }
 0x30f   : > { %796 = vsyncadd (%p634_p1), [#allocation7], 4294967168 }
 0x310 PF: > { %s17_s17 = sadd.s32 1, %s819_s17   ;;  %s983_s12 = smov %s803_s13 }
 0x311   : > { %p14_p2 = scmp.ge.s32.totalorder %s17_s17, 5   ;;  %s984_s13 = smov %s807_s14 }
 0x312   : > { %s985_s14 = smov %s900_s24  ;;  %s986_s15 = smov %s815_s16 }
 0x313   : > { %s987_s16 = smov %s989_s19  ;;  %16 = sbr.rel (!%p14_p2) target bundleno = 5 (0x5), region = 84 }
 0x318   :  { %480 = vsyncpa [#allocation6], 1 }
 0x319   :  { %482 = vsyncpa [#allocation6 + $0x1], 1 }
 0x31a   :  { %483 = vsyncpa [#allocation7], 1 }
 0x31b   :  { %485 = vsyncpa [#allocation7 + $0x1], 1 }

</bundles_post_ra>
